<compile_context>
chip_gen: v5e
topology: v5e:2x2
jax: 0.10.0
libtpu: 0.0.40
codegen_flags: <defaults>
</compile_context>

<pallas_src>
import functools

import jax
import jax.numpy as jnp
from jax.experimental import pallas as pl
from jax.experimental.pallas import tpu as pltpu


def _max_entropy_ce_kernel(x_ref, out_ref, *, C, R, S, need_mask):
    """One (batch, spatial-row-tile) grid step.

    x_ref:   (1, C, R, 128) logits block (original input dtype).
    out_ref: (1, 1, 1, 128) f32 block; per-lane partial sums of sum_c p*logp.
    """
    # Pass 1: channel max (elementwise VPU across C dense (R,128) slabs).
    m = x_ref[0, 0].astype(jnp.float32)
    for c in range(1, C):
        m = jnp.maximum(m, x_ref[0, c].astype(jnp.float32))

    # Pass 2: denom = sum_c exp(x-m), num = sum_c (x-m)*exp(x-m).
    # Channels are processed one at a time (C is a small static constant), so
    # only a few (R,128) f32 temporaries are live, not 4 full (C,R,128) copies.
    denom = jnp.zeros_like(m)
    num = jnp.zeros_like(m)
    for c in range(C):
        xm = x_ref[0, c].astype(jnp.float32) - m
        e = jnp.exp(xm)
        denom = denom + e
        num = num + xm * e

    # sum_c p*logp = num/denom - log(denom)   (since sum_c p == 1).
    # Exact divide: the kernel is HBM-bound, so the EUP-approx reciprocal buys
    # nothing and would add ~1e-3-level relative error.
    plogp = num / denom - jnp.log(denom)                     # (R, 128)

    if need_mask:
        # Zero out padded lanes / out-of-range tail rows via select (NOT a
        # multiply-mask, so garbage Inf/NaN in OOB rows cannot propagate).
        t = pl.program_id(1)
        row = jax.lax.broadcasted_iota(jnp.int32, plogp.shape, 0)
        lane = jax.lax.broadcasted_iota(jnp.int32, plogp.shape, 1)
        pos = (t * R + row) * 128 + lane
        plogp = jnp.where(pos < S, plogp, 0.0)

    # Per-lane partial sum over rows -> lane-dense (1,128) writeback (512 B).
    out_ref[...] = jnp.sum(plogp, axis=0, keepdims=True).reshape(out_ref.shape)


def _pick_row_tile(n_rows, n_channels, itemsize, batch,
                   target_block_bytes=4 << 20, vmem_budget_bytes=36 << 20):
    """Rows per spatial tile.

    The (1, C, R, 128) input block targets ~target_block_bytes, and
    2x(input block) + ~8 f32 (R,128) temporaries stay under the (v7x-safe)
    VMEM budget.  R is a multiple of 8, or equals n_rows (full array dim).
    Exact divisibility of n_rows is NOT required (cdiv grid + in-kernel mask).
    """
    r_target = target_block_bytes // (n_channels * 128 * itemsize)
    r_vmem = vmem_budget_bytes // (128 * (2 * n_channels * itemsize + 8 * 4))
    r = max(8, int(min(r_target, r_vmem)) // 8 * 8)
    if r < n_rows:
        return r                    # multiple of 8; ragged tail handled by mask
    if batch == 1 and n_rows >= 16:
        # v7x has 2 TensorCores: keep >= 2 parallel grid steps even for B == 1.
        return (-(-n_rows // 2) + 7) // 8 * 8
    return n_rows                   # single tile; block dim == full array dim


def max_entropy_loss_ce(logits, reduce="mean"):
    """Pallas implementation of MaxEntropyLossCE.forward (reduce='mean'|'sum')."""
    if reduce not in ("mean", "sum"):
        # TODO(synk): reduce='none' needs a (B, S) per-pixel entropy-map output;
        # only the scalar reductions are implemented here.
        raise ValueError("Invalid reduction method. Use 'mean' or 'sum'.")

    B, C = logits.shape[0], logits.shape[1]
    x = logits.reshape(B, C, -1)                    # (B, C, S); keep input dtype
    S = x.shape[-1]
    itemsize = jnp.dtype(x.dtype).itemsize

    # Lane-align the spatial axis.  For typical vision shapes S % 128 == 0 and
    # the reshape below is free (no copy); otherwise pad up to the next 128.
    # TODO(synk): for very large ragged S, pad only the tail chunk instead of
    # the whole tensor to avoid the extra HBM copy.
    s_pad = -(-S // 128) * 128
    if s_pad != S:
        x = jnp.pad(x, ((0, 0), (0, 0), (0, s_pad - S)))
    n_rows = s_pad // 128
    x = x.reshape(B, C, n_rows, 128)                # channels off the vreg

    R = _pick_row_tile(n_rows, C, itemsize, B)
    n_t = -(-n_rows // R)
    need_mask = (n_t * R * 128) != S                # padded lanes / ragged rows

    block_bytes = C * R * 128 * itemsize
    # Double-buffered input + f32 per-channel temporaries + headroom, capped at
    # 48 MiB so we never claim all of v7x's 64 MiB physical VMEM.
    vmem_limit = int(min(48 << 20,
                         max(16 << 20,
                             2 * block_bytes + 10 * R * 128 * 4 + (2 << 20))))

    kernel = functools.partial(_max_entropy_ce_kernel,
                               C=C, R=R, S=S, need_mask=need_mask)
    partials = pl.pallas_call(
        kernel,
        out_shape=jax.ShapeDtypeStruct((B, n_t, 1, 128), jnp.float32),
        grid_spec=pltpu.PrefetchScalarGridSpec(
            num_scalar_prefetch=0,
            grid=(B, n_t),
            in_specs=[pl.BlockSpec((1, C, R, 128), lambda b, t: (b, 0, t, 0))],
            out_specs=pl.BlockSpec((1, 1, 1, 128), lambda b, t: (b, t, 0, 0)),
        ),
        compiler_params=pltpu.CompilerParams(
            dimension_semantics=("parallel", "parallel"),
            vmem_limit_bytes=vmem_limit,
        ),
        cost_estimate=pl.CostEstimate(
            flops=6 * B * C * S,
            transcendentals=B * S * (C + 1),
            bytes_accessed=B * C * n_rows * 128 * itemsize + B * n_t * 128 * 4,
        ),
    )(x)

    # total = sum over all (b, pixel) of sum_c p*logp  (== -sum entropy)
    total = jnp.sum(partials)
    if reduce == "mean":
        return total / jnp.float32(B * S)
    return total


def _reference_loss(logits, reduce="mean"):
    B, C = logits.shape[0], logits.shape[1]
    x = logits.reshape(B, C, -1).astype(jnp.float32)
    logp = jax.nn.log_softmax(x, axis=1)
    p = jax.nn.softmax(x, axis=1)
    entropy = -jnp.sum(p * logp, axis=1)            # (B, S)
    if reduce == "mean":
        return -jnp.mean(entropy)
    return -jnp.sum(entropy)


if __name__ == "__main__":
    key = jax.random.PRNGKey(0)
    cases = [
        ((2, 4, 16, 16), jnp.float32),   # S=256: one tile per batch, no mask
        ((2, 4, 10, 15), jnp.float32),   # S=150: padded lanes, mask path
        ((1, 3, 32, 64), jnp.float32),   # B=1: spatial axis split into 2 tiles
        ((1, 4, 40, 64), jnp.float32),   # ragged row tiling (OOB tail rows masked)
        ((2, 4, 16, 16), jnp.bfloat16),  # bf16 on the wire
    ]
    for shape, dtype in cases:
        k, key = jax.random.split(key)
        logits = jax.random.normal(k, shape, dtype=jnp.float32).astype(dtype)
        for reduce in ("mean", "sum"):
            loss = jax.block_until_ready(max_entropy_loss_ce(logits, reduce=reduce))
            ref = _reference_loss(logits, reduce=reduce)
            assert jnp.allclose(loss, ref, atol=1e-4, rtol=1e-4), (
                shape, dtype, reduce, loss, ref)

    print("KERNEL_OK")
</pallas_src>

<mosaic_0001>
module attributes {stable_mosaic.version = 11 : i64} {
  func.func @_max_entropy_ce_kernel(%arg0: i32, %arg1: i32, %arg2: memref<1x4x2x128xf32, #tpu.memory_space<vmem>>, %arg3: memref<1x1x1x128xf32, #tpu.memory_space<vmem>>) attributes {dimension_semantics = [#tpu.dimension_semantics<parallel>, #tpu.dimension_semantics<parallel>], iteration_bounds = array<i64: 2, 1>, scalar_prefetch = 0 : i64, scratch_operands = 0 : i64, tpu.core_type = #tpu.core_type<tc>, window_params = [{transform_indices = @transform_0, window_bounds = array<i64: 1, 4, 2, 128>}, {transform_indices = @transform_1, window_bounds = array<i64: 1, 1, 1, 128>}]} {
    %c0 = arith.constant 0 : index
    %c0_0 = arith.constant 0 : index
    %c0_1 = arith.constant 0 : index
    %c0_2 = arith.constant 0 : index
    %0 = vector.load %arg2[%c0, %c0_0, %c0_1, %c0_2] : memref<1x4x2x128xf32, #tpu.memory_space<vmem>>, vector<1x1x2x128xf32>
    %1 = vector.shape_cast %0 : vector<1x1x2x128xf32> to vector<2x128xf32>
    %c0_3 = arith.constant 0 : index
    %c1 = arith.constant 1 : index
    %c0_4 = arith.constant 0 : index
    %c0_5 = arith.constant 0 : index
    %2 = vector.load %arg2[%c0_3, %c1, %c0_4, %c0_5] : memref<1x4x2x128xf32, #tpu.memory_space<vmem>>, vector<1x1x2x128xf32>
    %3 = vector.shape_cast %2 : vector<1x1x2x128xf32> to vector<2x128xf32>
    %4 = arith.maximumf %1, %3 : vector<2x128xf32>
    %c0_6 = arith.constant 0 : index
    %c2 = arith.constant 2 : index
    %c0_7 = arith.constant 0 : index
    %c0_8 = arith.constant 0 : index
    %5 = vector.load %arg2[%c0_6, %c2, %c0_7, %c0_8] : memref<1x4x2x128xf32, #tpu.memory_space<vmem>>, vector<1x1x2x128xf32>
    %6 = vector.shape_cast %5 : vector<1x1x2x128xf32> to vector<2x128xf32>
    %7 = arith.maximumf %4, %6 : vector<2x128xf32>
    %c0_9 = arith.constant 0 : index
    %c3 = arith.constant 3 : index
    %c0_10 = arith.constant 0 : index
    %c0_11 = arith.constant 0 : index
    %8 = vector.load %arg2[%c0_9, %c3, %c0_10, %c0_11] : memref<1x4x2x128xf32, #tpu.memory_space<vmem>>, vector<1x1x2x128xf32>
    %9 = vector.shape_cast %8 : vector<1x1x2x128xf32> to vector<2x128xf32>
    %10 = arith.maximumf %7, %9 : vector<2x128xf32>
    %cst = arith.constant 0.000000e+00 : f32
    %11 = vector.broadcast %cst : f32 to vector<2x128xf32>
    %cst_12 = arith.constant 0.000000e+00 : f32
    %12 = vector.broadcast %cst_12 : f32 to vector<2x128xf32>
    %c0_13 = arith.constant 0 : index
    %c0_14 = arith.constant 0 : index
    %c0_15 = arith.constant 0 : index
    %c0_16 = arith.constant 0 : index
    %13 = vector.load %arg2[%c0_13, %c0_14, %c0_15, %c0_16] : memref<1x4x2x128xf32, #tpu.memory_space<vmem>>, vector<1x1x2x128xf32>
    %14 = vector.shape_cast %13 : vector<1x1x2x128xf32> to vector<2x128xf32>
    %15 = arith.subf %14, %10 : vector<2x128xf32>
    %16 = math.exp %15 : vector<2x128xf32>
    %17 = arith.addf %11, %16 : vector<2x128xf32>
    %18 = arith.mulf %15, %16 : vector<2x128xf32>
    %19 = arith.addf %12, %18 : vector<2x128xf32>
    %c0_17 = arith.constant 0 : index
    %c1_18 = arith.constant 1 : index
    %c0_19 = arith.constant 0 : index
    %c0_20 = arith.constant 0 : index
    %20 = vector.load %arg2[%c0_17, %c1_18, %c0_19, %c0_20] : memref<1x4x2x128xf32, #tpu.memory_space<vmem>>, vector<1x1x2x128xf32>
    %21 = vector.shape_cast %20 : vector<1x1x2x128xf32> to vector<2x128xf32>
    %22 = arith.subf %21, %10 : vector<2x128xf32>
    %23 = math.exp %22 : vector<2x128xf32>
    %24 = arith.addf %17, %23 : vector<2x128xf32>
    %25 = arith.mulf %22, %23 : vector<2x128xf32>
    %26 = arith.addf %19, %25 : vector<2x128xf32>
    %c0_21 = arith.constant 0 : index
    %c2_22 = arith.constant 2 : index
    %c0_23 = arith.constant 0 : index
    %c0_24 = arith.constant 0 : index
    %27 = vector.load %arg2[%c0_21, %c2_22, %c0_23, %c0_24] : memref<1x4x2x128xf32, #tpu.memory_space<vmem>>, vector<1x1x2x128xf32>
    %28 = vector.shape_cast %27 : vector<1x1x2x128xf32> to vector<2x128xf32>
    %29 = arith.subf %28, %10 : vector<2x128xf32>
    %30 = math.exp %29 : vector<2x128xf32>
    %31 = arith.addf %24, %30 : vector<2x128xf32>
    %32 = arith.mulf %29, %30 : vector<2x128xf32>
    %33 = arith.addf %26, %32 : vector<2x128xf32>
    %c0_25 = arith.constant 0 : index
    %c3_26 = arith.constant 3 : index
    %c0_27 = arith.constant 0 : index
    %c0_28 = arith.constant 0 : index
    %34 = vector.load %arg2[%c0_25, %c3_26, %c0_27, %c0_28] : memref<1x4x2x128xf32, #tpu.memory_space<vmem>>, vector<1x1x2x128xf32>
    %35 = vector.shape_cast %34 : vector<1x1x2x128xf32> to vector<2x128xf32>
    %36 = arith.subf %35, %10 : vector<2x128xf32>
    %37 = math.exp %36 : vector<2x128xf32>
    %38 = arith.addf %31, %37 : vector<2x128xf32>
    %39 = arith.mulf %36, %37 : vector<2x128xf32>
    %40 = arith.addf %33, %39 : vector<2x128xf32>
    %41 = arith.divf %40, %38 : vector<2x128xf32>
    %42 = math.log %38 : vector<2x128xf32>
    %43 = arith.subf %41, %42 : vector<2x128xf32>
    %cst_29 = arith.constant dense<0.000000e+00> : vector<128xf32>
    %44 = vector.multi_reduction <add>, %43, %cst_29 [0] : vector<2x128xf32> to vector<128xf32>
    %45 = vector.shape_cast %44 : vector<128xf32> to vector<1x128xf32>
    %46 = vector.shape_cast %45 : vector<1x128xf32> to vector<1x1x1x128xf32>
    %c0_30 = arith.constant 0 : index
    %c0_31 = arith.constant 0 : index
    %c0_32 = arith.constant 0 : index
    %c0_33 = arith.constant 0 : index
    %47 = vector.load %arg3[%c0_30, %c0_31, %c0_32, %c0_33] : memref<1x1x1x128xf32, #tpu.memory_space<vmem>>, vector<1x1x1x128xf32>
    tpu.vector_store %arg3[%c0_30, %c0_31, %c0_32, %c0_33], %46 {strides = array<i32>} : memref<1x1x1x128xf32, #tpu.memory_space<vmem>>, vector<1x1x1x128xf32>,
    return
  }
  func.func @transform_0(%arg0: i32, %arg1: i32) -> (i32, i32, i32, i32) {
    %c0_i32 = arith.constant 0 : i32
    %c0_i32_0 = arith.constant 0 : i32
    %c0_i32_1 = arith.constant 0 : i32
    return %arg0, %c0_i32, %arg1, %c0_i32_0 : i32, i32, i32, i32
  }
  func.func @transform_1(%arg0: i32, %arg1: i32) -> (i32, i32, i32, i32) {
    %c0_i32 = arith.constant 0 : i32
    %c0_i32_0 = arith.constant 0 : i32
    %c0_i32_1 = arith.constant 0 : i32
    return %arg0, %arg1, %c0_i32, %c0_i32_0 : i32, i32, i32, i32
  }
}

</mosaic_0001>

<bundles_post_ra>
// kernel: tpu_custom_call.1
= control target key start
LH: loop header
LB: loop body
LE: loop exit
PB: predicated region body
PF: predicated region fallthrough
CT: control target
= control target key end

     0   :  { %6 = vsyncpa [#allocation3], 0  ;;  %s643_s0 = inlined_call_operand.hbm [shape: f32[2,4,2,128], index: 0, kind: input, shape index: {}]   ;;  %s644_s1 = inlined_call_operand.hbm [shape: f32[2,1,1,128], index: 1, kind: output, shape index: {}]  }
   0x1   :  { %8 = vsyncpa [#allocation3 + $0x1], 0 }
   0x2   :  { %9 = vsyncpa [#allocation4], 0 }
   0x3   :  { %11 = vsyncpa [#allocation4 + $0x1], 0  ;;  %s522_s6 = smov 0   ;;  %s524_s7 = smov 0  }
   0x4   :  { %s526_s8 = smov 0   ;;  %s528_s9 = smov 0  }
   0x5   :  { %s530_s10 = smov 0   ;;  %s532_s11 = smov 0  }
   0x6 LB: > { %s305_s12 = sadd.s32 4294967295, %s508_s11   ;;  %s306_s13 = sadd.s32 4294967294, %s508_s11   ;;  %s508_s11 = sphi %s532_s11, %s17_s11   ;;  %s504_s10 = sphi %s530_s10, %s653_s10   ;;  %s500_s9 = sphi %s528_s9, %s652_s9   ;;  %s496_s8 = sphi %s526_s8, %s651_s8   ;;  %s492_s7 = sphi %s524_s7, %s650_s7   ;;  %s488_s6 = sphi %s522_s6, %s649_s6  }
   0x7   : > { %s29_s14 = sadd.s32 1, %s504_s10  ;;  %s38_s15 = sadd.s32 1, %s496_s8 }
   0x8   : > { %p31_p0 = scmp.ge.s32.totalorder %s29_s14, 2  ;;  %p45_p1 = scmp.ne.s32.totalorder %s496_s8, %s492_s7 }
   0x9   : > { %p46_p2 = scmp.eq.s32.totalorder %s508_s11, 0  ;;  %p51_p3 = scmp.ne.s32.totalorder %s492_s7, %s488_s6 }
   0xa   : > { %s655_s14 = smov (%p31_p0, %s29_s14), 0  ;;  %p52_p5 = scmp.eq.s32.totalorder %s305_s12, 0 }
   0xb   : > { %p563_p4 = por %p46_p2, %p45_p1  ;;  %s33_s17 = ssub.s32 %s504_s10, %s655_s14 }
   0xc   : > { %p77_p6 = scmp.eq.s32.totalorder %s305_s12, 1  ;;  %p36_p7 = scmp.eq.s32.totalorder %s33_s17, 0 }
   0xd   : > { %p569_p8 = por %p52_p5, %p51_p3  ;;  %p83_p10 = scmp.eq.s32.totalorder %s306_s13, 1 }
   0xe   : > { %p573_p9 = por %p77_p6, %p45_p1  ;;  %p308_p12 = scmp.ge.s32.totalorder %s508_s11, 2 }
   0xf   : > { %s578_s20 = scalar_select %p36_p7, %s496_s8, %s38_s15  }
  0x10   : > { %p580_p11 = por %p83_p10, %p51_p3  ;;  %p332_p13 = scmp.lt.s32.totalorder %s508_s11, 2 }
  0x11   : > { %s103_s22 = sand.u32 1, %s496_s8   ;;  %s319_s24 = sshll.u32 %s504_s10, 3 }
  0x12   : > { %s309_s23 = sshll.u32 %s103_s22, 3  ;;  %s113_s27 = scalar_lea.hbm %s643_s0, %s319_s24 }
  0x13   : > { %s107_s28 = scalar_lea.vmem [#allocation2], %s309_s23  ;;  %s114_s30 = sshll.u32 %s113_s27, 4  ;;  %s115_s30 = int_to_ptr.hbm [resolvable:$true] %s114_s30 }
  0x14   : > { %s116_s29 = sshll.u32 %s107_s28, 4  ;;  %p325_p0 = pnand %p332_p13, %p563_p4  ;;  %s117_s29 = int_to_ptr.vmem [resolvable:$true] %s116_s29 }
  0x15   : > { %p312_p1 = scmp.ge.s32.totalorder %s508_s11, 1  ;;  %s104_s2 = scalar_lea.sflag [#allocation3], %s103_s22 }
  0x16   : > { %s510_s3 = smov 32   ;;  %s511_s4 = smov 2  }
  0x17   : > { %327 = dma.hbm_to_vmem [thread:$0]  (!%p325_p0), %s115_s30, 128, %s117_s29, %s104_s2, %s510_s3, %s510_s3, %s511_s4  }
  0x18   : > { %p124_p2 = scmp.lt.s32.totalorder %s508_s11, 3 }
  0x1a   : > { %p125_p3 = pnand %p312_p1, %p124_p2 }
  0x1b   : > { %s596_s5 = sand.u32 (!%p125_p3), 1, %s492_s7  }
  0x1c   : > { %128 = sbr.rel (%p125_p3) target bundleno = 96 (0x60), region = 24  ;;  %s313_s12 = sshll.u32 (!%p125_p3), %s596_s5, 3 }
  0x1d   : > { %s131_s13 = scalar_lea.sflag (!%p125_p3), [#allocation3], %s596_s5  ;;  %s134_s15 = scalar_lea.vmem (!%p125_p3), [#allocation2], %s313_s12 }
  0x21   : > { %479 = dma.done.wait (%p569_p8), %s131_s13, 128  }
  0x22   : > { %481 = vsyncadd (%p569_p8), %s131_s13, 4294967168  ;;  %v153_v0 = vld [vmem:[%s134_s15] sm:$0x3]  ;;  %v314_v1 = vld [vmem:[%s134_s15 + $0x2] sm:$0x3]  ;;  %vm205_vm4 = vcmask 1041408   ;;  %s224_s18 = scalar_lea.hbm %s644_s1, %s500_s9 }
  0x23   : > { %v315_v2 = vld [vmem:[%s134_s15 + $0x4] sm:$0x3]  ;;  %v156_v3 = vmax.f32 %v153_v0, %v314_v1  ;;  %v316_v4 = vld [vmem:[%s134_s15 + $0x6] sm:$0x3]  ;;  %s152_s22 = scalar_lea.vmem [#allocation5], %s596_s5  ;;  %s228_s24 = sshll.u32 %s224_s18, 4  ;;  %s229_s24 = int_to_ptr.hbm [resolvable:$true] %s228_s24 }
  0x24   : > { %s226_s23 = sshll.u32 %s152_s22, 4  ;;  %s215_s25 = scalar_lea.sflag [#allocation4], %s596_s5  ;;  %s227_s23 = int_to_ptr.vmem [resolvable:$true] %s226_s23 }
  0x25   : > { %v159_v5 = vmax.f32 %v156_v3, %v315_v2  ;;  %s440_s26 = sshra.s32 %s229_s24, 4  ;;  %s446_s9 = scalar_lea.hbm %s644_s1, 2  ;;  %s441_s26 = int_to_ptr.hbm [resolvable:$true] %s440_s26 }
  0x26   : > { %s442_s27 = scalar_lea.hbm %s441_s26, 1  ;;  %p447_p7 = scmp.lt.s32.totalorder %s441_s26, %s644_s1 }
  0x27   : > { %v162_v6 = vmax.f32 %v159_v5, %v316_v4  ;;  %p443_p4 = scmp.ne.s32.totalorder %s441_s26, %s442_s27  ;;  %p448_p8 = scmp.lt.s32.totalorder %s446_s9, %s442_s27 }
  0x29   : > { %v163_v7 = vsub.f32 %v153_v0, %v162_v6  ;;  %v169_v8 = vsub.f32 %v314_v1, %v162_v6  ;;  %v175_v9 = vsub.f32 %v315_v2, %v162_v6  ;;  %v181_v10 = vsub.f32 %v316_v4, %v162_v6  ;;  %p444_p5 = pnand %p443_p4, %p573_p9  ;;  %p449_p10 = por %p448_p8, %p447_p7 }
  0x2b   : > { %v164_v11 = vmul.f32 1.442695, %v163_v7  ;;  %v170_v12 = vmul.f32 1.442695, %v169_v8  ;;  %v176_v13 = vmul.f32 1.442695, %v175_v9  ;;  %p445_p6 = pneg %p444_p5 }
  0x2c   : > { %v182_v14 = vmul.f32 1.442695, %v181_v10 }
  0x2d   : > { %384 = vpow2.f32 %v164_v11  ;;  %p450_p13 = pnand %p449_p10, %p445_p6 }
  0x2e   : > { %386 = vpow2.f32 %v170_v12 }
  0x2f   : > { %388 = vpow2.f32 %v176_v13 }
  0x30   : > { %390 = vpow2.f32 %v182_v14 }
  0x33   : > { %v385_v15 = vpop.eup %384 }
  0x34   : > { %v387_v16 = vpop.eup %386  ;;  %v167_v22 = vmul.f32 %v385_v15, %v163_v7 }
  0x35   : > { %v389_v17 = vpop.eup %388  ;;  %v172_v18 = vadd.f32 %v387_v16, %v385_v15  ;;  %v173_v23 = vmul.f32 %v387_v16, %v169_v8 }
  0x36   : > { %v391_v19 = vpop.eup %390  ;;  %v179_v25 = vmul.f32 %v389_v17, %v175_v9 }
  0x37   : > { %v178_v20 = vadd.f32 %v389_v17, %v172_v18  ;;  %v174_v24 = vadd.f32 %v173_v23, %v167_v22  ;;  %v185_v29 = vmul.f32 %v391_v19, %v181_v10 }
  0x39   : > { %v184_v21 = vadd.f32 %v391_v19, %v178_v20  ;;  %v180_v28 = vadd.f32 %v179_v25, %v174_v24 }
  0x3b   : > { %392 = vrcp.f32 %v184_v21  ;;  %v198_v30 = vand.u32 2147483648, %v184_v21  ;;  %vm192_vm0 = vweird.f32 %v184_v21  ;;  %v196_v32 = vand.u32 2147483647, %v184_v21 }
  0x3c   : > { %394 = vlog2.f32 %v184_v21  ;;  %v186_v36 = vadd.f32 %v185_v29, %v180_v28 }
  0x3d   : > { %v199_v35 = vor.u32 1.1754944e-38, %v198_v30  ;;  %vm197_vm3 = vcmp.eq.f32.partialorder %v196_v32, 8.507059e+37 }
  0x41   : > { %v393_v26 = vpop.eup %392 }
  0x42   : > { %v188_v27 = vmul.f32 %v393_v26, %v184_v21  ;;  %vm193_vm1 = vweird.f32 %v393_v26  ;;  %v395_v34 = vpop.eup %394 }
  0x43   : > { %vm194_vm2 = vmor %vm192_vm0, %vm193_vm1  ;;  %v203_v39 = vmul.f32 0.6931472, %v395_v34 }
  0x44   : > { %v189_v31 = vsub.f32 1.0, %v188_v27 }
  0x46   : > { %v190_v33 = vmul.f32 %v393_v26, %v189_v31 }
  0x48   : > { %v191_v37 = vadd.f32 %v393_v26, %v190_v33 }
  0x4a   : > { %v195_v38 = vsel %vm194_vm2, %v393_v26, %v191_v37 }
  0x4b   : > { %v200_v40 = vsel %vm197_vm3, %v199_v35, %v195_v38 }
  0x4c   : > { %v201_v41 = vmul.f32 %v200_v40, %v186_v36 }
  0x4e   : > { %v204_v42 = vsub.f32 %v201_v41, %v203_v39 }
  0x50   : > { %v206_v43 = vsel %vm205_vm4, %v204_v42, 0.0 }
  0x51   : > { %v207_v44 = vrot.slane %v206_v43, 4 }
  0x53   : > { %v208_v45 = vadd.f32 %v207_v44, %v206_v43 }
  0x55   : > { %v209_v46 = vrot.slane %v208_v45, 2 }
  0x57   : > { %v210_v47 = vadd.f32 %v209_v46, %v208_v45 }
  0x59   : > { %v211_v48 = vrot.slane %v210_v47, 1 }
  0x5b   : > { %v212_v49 = vadd.f32 %v211_v48, %v210_v47 }
  0x5d   : > { %213 = vst [vmem:[%s152_s22] sm:$0x1] %v212_v49 }
  0x5e   : > { %453 = shalt.err (!%p450_p13)
}
  0x5f   : > { %322 = dma.vmem_to_hbm [thread:$0]  (%p573_p9), %s227_s23, 16, %s229_s24, %s215_s25  }
  0x60 PF: > { %s240_s3 = sand.u32 1, %s488_s6   ;;  %p329_p0 = pnand %p308_p12, %p580_p11 }
  0x61   : > { %s241_s4 = scalar_lea.sflag [#allocation4], %s240_s3 }
  0x62   : > { %p330_p1 = pneg %p329_p0 }
  0x64   : > { %483 = dma.done.wait (%p330_p1), %s241_s4, 16  }
  0x65   : > { %485 = vsyncadd (%p330_p1), %s241_s4, 4294967280  ;;  %s17_s11 = sadd.s32 1, %s508_s11   ;;  %s649_s6 = smov %s492_s7 }
  0x66   : > { %p14_p2 = scmp.ge.s32.totalorder %s17_s11, 4   ;;  %s650_s7 = smov %s496_s8 }
  0x67   : > { %s651_s8 = smov %s578_s20  ;;  %s652_s9 = smov %s504_s10 }
  0x68   : > { %s653_s10 = smov %s655_s14  ;;  %16 = sbr.rel (!%p14_p2) target bundleno = 6 (0x6), region = 72 }
  0x6d   :  { %246 = vsyncpa [#allocation3], 1 }
  0x6e   :  { %248 = vsyncpa [#allocation3 + $0x1], 1 }
  0x6f   :  { %249 = vsyncpa [#allocation4], 1 }
  0x70   :  { %251 = vsyncpa [#allocation4 + $0x1], 1 }

</bundles_post_ra>
